<compile_context>
chip_gen: v7x
topology: tpu7x:2x2x1
jax: 0.10.0
libtpu: 0.0.40
codegen_flags: <defaults>
</compile_context>

<pallas_src>
import jax
import jax.numpy as jnp
from jax.experimental import pallas as pl
from jax.experimental.pallas import tpu as pltpu

HIDDEN = 128
LANE = 128
DEFAULT_TILE_B = 512            # v6e sweet spot (~85% HBM roofline); VMEM-capped below
VMEM_BUDGET_BYTES = 40 << 20    # fits every generation's scoped/physical VMEM


def _cdiv(a, b):
    return (a + b - 1) // b


def _round_up(x, m):
    return ((x + m - 1) // m) * m


def mlp3_kernel(x_ref, w1_ref, b1_ref, w2_ref, b2_ref, w3_ref, b3_ref, o_ref):
    # x arrives in its native f32; cast to bf16 in-kernel instead of a wrapper pass.
    x = x_ref[...].astype(jnp.bfloat16)
    # Layer 1: Linear(num_input, 128) + ReLU (bf16 operands, f32 accumulate).
    h1 = jnp.dot(x, w1_ref[...], preferred_element_type=jnp.float32)
    h1 = jnp.maximum(h1 + b1_ref[...], 0.0)
    # Layer 2: Linear(128, 128) + ReLU.
    h2 = jnp.dot(h1.astype(jnp.bfloat16), w2_ref[...],
                 preferred_element_type=jnp.float32)
    h2 = jnp.maximum(h2 + b2_ref[...], 0.0)
    # Layer 3: Linear(128, num_output_padded), no activation.
    h3 = jnp.dot(h2.astype(jnp.bfloat16), w3_ref[...],
                 preferred_element_type=jnp.float32)
    # Store bf16 -> halves the dominant output HBM stream on this mem-bound layer.
    o_ref[...] = (h3 + b3_ref[...]).astype(o_ref.dtype)


def prepare_params(params):
    """One-time conversion: bf16 weights, f32 biases, output dim padded to 128 lanes.

    Do this once at init; keeps the per-call hot path free of cast/pad XLA ops.
    """
    w1, b1, w2, b2, w3, b3 = params
    Dout = w3.shape[1]
    Dout_p = max(LANE, _round_up(Dout, LANE))
    if Dout_p != Dout:
        w3 = jnp.pad(w3, ((0, 0), (0, Dout_p - Dout)))
        b3 = jnp.pad(b3, ((0, 0), (0, Dout_p - Dout)))
    prepared = (w1.astype(jnp.bfloat16), b1.astype(jnp.float32),
                w2.astype(jnp.bfloat16), b2.astype(jnp.float32),
                w3.astype(jnp.bfloat16), b3.astype(jnp.float32))
    return prepared, Dout


def network_layer3(x, prepared, num_output=None, tile_b=DEFAULT_TILE_B,
                   out_dtype=jnp.float32):
    w1, b1, w2, b2, w3, b3 = prepared
    B, Din = x.shape
    H = w1.shape[1]
    Dout_p = w3.shape[1]
    Dout = Dout_p if num_output is None else num_output

    weight_bytes = sum(int(a.size) * a.dtype.itemsize for a in prepared)

    # --- Balanced batch tile: minimizes padding (<= 7 rows) and keeps >=2 grid
    #     steps when the batch is large enough (v7x TensorCore sharding + pipeline).
    num_tiles = max(1, _cdiv(B, tile_b))
    tb = _round_up(_cdiv(B, num_tiles), 8)

    def _vmem_bytes(t):
        # double-buffered x (f32 in) + out (bf16), f32 intermediates, weights x2.
        return (2 * t * Din * 4 + 2 * t * Dout_p * 2
                + 4 * t * H * 4 + 2 * weight_bytes)

    while tb > 8 and _vmem_bytes(tb) > VMEM_BUDGET_BYTES:
        tb = _round_up(max(8, tb // 2), 8)

    Bp = _round_up(B, tb)
    if Bp != B:
        x = jnp.pad(x, ((0, Bp - B), (0, 0)))
    grid = (Bp // tb,)

    flops = 2 * Bp * (Din * H + H * H + H * Dout_p)
    bytes_accessed = Bp * Din * 4 + weight_bytes + Bp * Dout_p * 2
    vmem_limit = int(min(max(_vmem_bytes(tb) + (4 << 20), 16 << 20), 48 << 20))

    out = pl.pallas_call(
        mlp3_kernel,
        out_shape=jax.ShapeDtypeStruct((Bp, Dout_p), jnp.bfloat16),
        grid_spec=pltpu.PrefetchScalarGridSpec(
            num_scalar_prefetch=0,
            grid=grid,
            in_specs=[
                # x: tiled along batch (f32, cast in-kernel).
                pl.BlockSpec((tb, Din), lambda i: (i, 0)),
                # Weights / biases: resident (constant block index -> DMA'd once).
                # Note: on v7x one could add pipeline_mode=pl.Buffered(1) here to
                # single-buffer these constant blocks; omitted for portability.
                pl.BlockSpec((Din, H), lambda i: (0, 0)),
                pl.BlockSpec((1, H), lambda i: (0, 0)),
                pl.BlockSpec((H, H), lambda i: (0, 0)),
                pl.BlockSpec((1, H), lambda i: (0, 0)),
                pl.BlockSpec((H, Dout_p), lambda i: (0, 0)),
                pl.BlockSpec((1, Dout_p), lambda i: (0, 0)),
            ],
            out_specs=pl.BlockSpec((tb, Dout_p), lambda i: (i, 0)),
        ),
        compiler_params=pltpu.CompilerParams(
            dimension_semantics=("parallel",),
            vmem_limit_bytes=vmem_limit,
        ),
        cost_estimate=pl.CostEstimate(
            flops=flops, transcendentals=0, bytes_accessed=bytes_accessed),
    )(x, w1, b1, w2, b2, w3, b3)

    # Slice back to the logical shape only if padding was applied.
    if Bp != B or Dout_p != Dout:
        out = out[:B, :Dout]
    if out.dtype != out_dtype:
        out = out.astype(out_dtype)
    return out


def init_params(key, num_input, num_output):
    # Deterministic init mimicking nn.Linear's uniform(-1/sqrt(fan_in), 1/sqrt(fan_in)).
    ks = jax.random.split(key, 6)

    def lin(kw, kb, fan_in, fan_out):
        bound = 1.0 / jnp.sqrt(fan_in)
        w = jax.random.uniform(kw, (fan_in, fan_out), jnp.float32, -bound, bound)
        b = jax.random.uniform(kb, (1, fan_out), jnp.float32, -bound, bound)
        return w, b

    w1, b1 = lin(ks[0], ks[1], num_input, HIDDEN)
    w2, b2 = lin(ks[2], ks[3], HIDDEN, HIDDEN)
    w3, b3 = lin(ks[4], ks[5], HIDDEN, num_output)
    return (w1, b1, w2, b2, w3, b3)


def reference_f32(x, params):
    w1, b1, w2, b2, w3, b3 = params
    h = jnp.maximum(x @ w1 + b1, 0.0)
    h = jnp.maximum(h @ w2 + b2, 0.0)
    return h @ w3 + b3


def reference_bf16_rounded(x, params):
    # Mimics the kernel's numerics: bf16-rounded matmul operands, f32 accumulation,
    # f32 bias add / ReLU (final bf16 output rounding not modeled -> small tolerance).
    w1, b1, w2, b2, w3, b3 = params
    bf = lambda a: a.astype(jnp.bfloat16).astype(jnp.float32)
    h = jnp.maximum(bf(x) @ bf(w1) + b1, 0.0)
    h = jnp.maximum(bf(h) @ bf(w2) + b2, 0.0)
    return bf(h) @ bf(w3) + b3


if __name__ == "__main__":
    batch, num_input, num_output = 8, 32, 16
    key = jax.random.PRNGKey(0)
    kx, kp = jax.random.split(key)
    x = jax.random.normal(kx, (batch, num_input), jnp.float32)
    params = init_params(kp, num_input, num_output)
    prepared, _ = prepare_params(params)   # one-time weight prep (off the hot path)

    out = network_layer3(x, prepared, num_output=num_output)
    out = jax.block_until_ready(out)

    ref_bf = reference_bf16_rounded(x, params)
    ref_f32 = reference_f32(x, params)
    assert out.shape == (batch, num_output)
    assert out.dtype == jnp.float32
    # Tight check vs a reference mimicking the kernel's bf16-operand numerics
    # (tolerance covers the final bf16 output rounding).
    assert jnp.allclose(out, ref_bf, atol=2e-2, rtol=2e-2)
    # Loose sanity check vs the pure-f32 reference.
    assert jnp.allclose(out, ref_f32, atol=1e-1, rtol=1e-1)
    print("KERNEL_OK")
</pallas_src>

<mosaic_0001>
module attributes {stable_mosaic.version = 11 : i64} {
  func.func @mlp3_kernel(%arg0: i32, %arg1: memref<8x32xf32, #tpu.memory_space<vmem>>, %arg2: memref<32x128xbf16, #tpu.memory_space<vmem>>, %arg3: memref<1x128xf32, #tpu.memory_space<vmem>>, %arg4: memref<128x128xbf16, #tpu.memory_space<vmem>>, %arg5: memref<1x128xf32, #tpu.memory_space<vmem>>, %arg6: memref<128x128xbf16, #tpu.memory_space<vmem>>, %arg7: memref<1x128xf32, #tpu.memory_space<vmem>>, %arg8: memref<8x128xbf16, #tpu.memory_space<vmem>>) attributes {dimension_semantics = [#tpu.dimension_semantics<parallel>], iteration_bounds = array<i64: 1>, scalar_prefetch = 0 : i64, scratch_operands = 0 : i64, tpu.core_type = #tpu.core_type<tc>, window_params = [{transform_indices = @transform_0, window_bounds = array<i64: 8, 32>}, {pipeline_mode = #tpu.pipeline_mode<synchronous>, transform_indices = @transform_1, window_bounds = array<i64: 32, 128>}, {pipeline_mode = #tpu.pipeline_mode<synchronous>, transform_indices = @transform_2, window_bounds = array<i64: 1, 128>}, {pipeline_mode = #tpu.pipeline_mode<synchronous>, transform_indices = @transform_3, window_bounds = array<i64: 128, 128>}, {pipeline_mode = #tpu.pipeline_mode<synchronous>, transform_indices = @transform_4, window_bounds = array<i64: 1, 128>}, {pipeline_mode = #tpu.pipeline_mode<synchronous>, transform_indices = @transform_5, window_bounds = array<i64: 128, 128>}, {pipeline_mode = #tpu.pipeline_mode<synchronous>, transform_indices = @transform_6, window_bounds = array<i64: 1, 128>}, {transform_indices = @transform_7, window_bounds = array<i64: 8, 128>}]} {
    %c0 = arith.constant 0 : index
    %c0_0 = arith.constant 0 : index
    %0 = vector.load %arg1[%c0, %c0_0] : memref<8x32xf32, #tpu.memory_space<vmem>>, vector<8x32xf32>
    %1 = arith.truncf %0 : vector<8x32xf32> to vector<8x32xbf16>
    %c0_1 = arith.constant 0 : index
    %c0_2 = arith.constant 0 : index
    %2 = vector.load %arg2[%c0_1, %c0_2] : memref<32x128xbf16, #tpu.memory_space<vmem>>, vector<32x128xbf16>
    %cst = arith.constant dense<0.000000e+00> : vector<8x128xf32>
    %3 = tpu.matmul %1, %2, %cst {dimension_numbers = #tpu.dot_dimension_numbers<[1], [0], [0], [1], [0, 0, 1, 1], [], []>} : vector<8x32xbf16>, vector<32x128xbf16>, vector<8x128xf32> -> vector<8x128xf32>
    %c0_3 = arith.constant 0 : index
    %c0_4 = arith.constant 0 : index
    %4 = vector.load %arg3[%c0_3, %c0_4] : memref<1x128xf32, #tpu.memory_space<vmem>>, vector<1x128xf32>
    %5 = vector.broadcast %4 : vector<1x128xf32> to vector<8x128xf32>
    %6 = arith.addf %3, %5 : vector<8x128xf32>
    %cst_5 = arith.constant 0.000000e+00 : f32
    %7 = vector.broadcast %cst_5 : f32 to vector<8x128xf32>
    %8 = arith.maximumf %6, %7 : vector<8x128xf32>
    %9 = arith.truncf %8 : vector<8x128xf32> to vector<8x128xbf16>
    %c0_6 = arith.constant 0 : index
    %c0_7 = arith.constant 0 : index
    %10 = vector.load %arg4[%c0_6, %c0_7] : memref<128x128xbf16, #tpu.memory_space<vmem>>, vector<128x128xbf16>
    %cst_8 = arith.constant dense<0.000000e+00> : vector<8x128xf32>
    %11 = tpu.matmul %9, %10, %cst_8 {dimension_numbers = #tpu.dot_dimension_numbers<[1], [0], [0], [1], [0, 0, 1, 1], [], []>} : vector<8x128xbf16>, vector<128x128xbf16>, vector<8x128xf32> -> vector<8x128xf32>
    %c0_9 = arith.constant 0 : index
    %c0_10 = arith.constant 0 : index
    %12 = vector.load %arg5[%c0_9, %c0_10] : memref<1x128xf32, #tpu.memory_space<vmem>>, vector<1x128xf32>
    %13 = vector.broadcast %12 : vector<1x128xf32> to vector<8x128xf32>
    %14 = arith.addf %11, %13 : vector<8x128xf32>
    %cst_11 = arith.constant 0.000000e+00 : f32
    %15 = vector.broadcast %cst_11 : f32 to vector<8x128xf32>
    %16 = arith.maximumf %14, %15 : vector<8x128xf32>
    %17 = arith.truncf %16 : vector<8x128xf32> to vector<8x128xbf16>
    %c0_12 = arith.constant 0 : index
    %c0_13 = arith.constant 0 : index
    %18 = vector.load %arg6[%c0_12, %c0_13] : memref<128x128xbf16, #tpu.memory_space<vmem>>, vector<128x128xbf16>
    %cst_14 = arith.constant dense<0.000000e+00> : vector<8x128xf32>
    %19 = tpu.matmul %17, %18, %cst_14 {dimension_numbers = #tpu.dot_dimension_numbers<[1], [0], [0], [1], [0, 0, 1, 1], [], []>} : vector<8x128xbf16>, vector<128x128xbf16>, vector<8x128xf32> -> vector<8x128xf32>
    %c0_15 = arith.constant 0 : index
    %c0_16 = arith.constant 0 : index
    %20 = vector.load %arg7[%c0_15, %c0_16] : memref<1x128xf32, #tpu.memory_space<vmem>>, vector<1x128xf32>
    %21 = vector.broadcast %20 : vector<1x128xf32> to vector<8x128xf32>
    %22 = arith.addf %19, %21 : vector<8x128xf32>
    %23 = arith.truncf %22 : vector<8x128xf32> to vector<8x128xbf16>
    %c0_17 = arith.constant 0 : index
    %c0_18 = arith.constant 0 : index
    %24 = vector.load %arg8[%c0_17, %c0_18] : memref<8x128xbf16, #tpu.memory_space<vmem>>, vector<8x128xbf16>
    tpu.vector_store %arg8[%c0_17, %c0_18], %23 {strides = array<i32>} : memref<8x128xbf16, #tpu.memory_space<vmem>>, vector<8x128xbf16>,
    return
  }
  func.func @transform_0(%arg0: i32) -> (i32, i32) {
    %c0_i32 = arith.constant 0 : i32
    %c0_i32_0 = arith.constant 0 : i32
    return %arg0, %c0_i32 : i32, i32
  }
  func.func @transform_1(%arg0: i32) -> (i32, i32) {
    %c0_i32 = arith.constant 0 : i32
    %c0_i32_0 = arith.constant 0 : i32
    %c0_i32_1 = arith.constant 0 : i32
    return %c0_i32, %c0_i32_0 : i32, i32
  }
  func.func @transform_2(%arg0: i32) -> (i32, i32) {
    %c0_i32 = arith.constant 0 : i32
    %c0_i32_0 = arith.constant 0 : i32
    %c0_i32_1 = arith.constant 0 : i32
    return %c0_i32, %c0_i32_0 : i32, i32
  }
  func.func @transform_3(%arg0: i32) -> (i32, i32) {
    %c0_i32 = arith.constant 0 : i32
    %c0_i32_0 = arith.constant 0 : i32
    %c0_i32_1 = arith.constant 0 : i32
    return %c0_i32, %c0_i32_0 : i32, i32
  }
  func.func @transform_4(%arg0: i32) -> (i32, i32) {
    %c0_i32 = arith.constant 0 : i32
    %c0_i32_0 = arith.constant 0 : i32
    %c0_i32_1 = arith.constant 0 : i32
    return %c0_i32, %c0_i32_0 : i32, i32
  }
  func.func @transform_5(%arg0: i32) -> (i32, i32) {
    %c0_i32 = arith.constant 0 : i32
    %c0_i32_0 = arith.constant 0 : i32
    %c0_i32_1 = arith.constant 0 : i32
    return %c0_i32, %c0_i32_0 : i32, i32
  }
  func.func @transform_6(%arg0: i32) -> (i32, i32) {
    %c0_i32 = arith.constant 0 : i32
    %c0_i32_0 = arith.constant 0 : i32
    %c0_i32_1 = arith.constant 0 : i32
    return %c0_i32, %c0_i32_0 : i32, i32
  }
  func.func @transform_7(%arg0: i32) -> (i32, i32) {
    %c0_i32 = arith.constant 0 : i32
    %c0_i32_0 = arith.constant 0 : i32
    return %arg0, %c0_i32 : i32, i32
  }
}

</mosaic_0001>

<bundles_post_ra>
// kernel: tpu_custom_call.1
= control target key start
LH: loop header
LB: loop body
LE: loop exit
PB: predicated region body
PF: predicated region fallthrough
CT: control target
= control target key end

     0   :  { %12 = vsyncpa [#allocation3], 0  ;;  %s782_s0 = inlined_call_operand.hbm [shape: f32[8,32], index: 0, kind: input, shape index: {}]   ;;  %s783_s1 = inlined_call_operand.hbm [shape: bf16[32,128], index: 1, kind: input, shape index: {}]   ;;  %s784_s2 = inlined_call_operand.vmem [shape: f32[1,128], index: 2, kind: input, shape index: {}]   ;;  %s785_s3 = inlined_call_operand.hbm [shape: bf16[128,128], index: 3, kind: input, shape index: {}]   ;;  %s786_s4 = inlined_call_operand.vmem [shape: f32[1,128], index: 4, kind: input, shape index: {}]   ;;  %s787_s5 = inlined_call_operand.hbm [shape: bf16[128,128], index: 5, kind: input, shape index: {}]   ;;  %s788_s6 = inlined_call_operand.vmem [shape: f32[1,128], index: 6, kind: input, shape index: {}]   ;;  %s789_s7 = inlined_call_operand.hbm [shape: bf16[8,128], index: 7, kind: output, shape index: {}]  }
   0x1   :  { %13 = vsyncpa [#allocation6], 0 }
   0x2   :  { %14 = vsyncpa [#allocation9], 0 }
   0x3   :  { %15 = vsyncpa [#allocation4], 0  ;;  %s631_s24 = smov [#allocation5]   ;;  %s513_s28 = scalar_lea.hbm %s783_s1, 256 }
   0x4   :  { %s31_s25 = sshll.u32 %s631_s24, 4  ;;  %p514_p0 = scmp.ne.s32.totalorder %s783_s1, %s513_s28  ;;  %s32_s25 = int_to_ptr.vmem [resolvable:$true] %s31_s25 }
   0x5   :  { %p517_p1 = scmp.lt.u32.totalorder %s513_s28, %s783_s1 }
   0x7   :  { %p519_p2 = pnand %p517_p1, %p514_p0 }
   0x9   :  { %522 = shalt.err (!%p519_p2)
}
   0xa   :  { %s523_s10 = scalar_lea.vmem %s32_s25, 256  ;;  %p528_p4 = scmp.lt.s32.totalorder %s32_s25, %s32_s25 }
   0xb   :  { %p524_p3 = scmp.ne.s32.totalorder %s32_s25, %s523_s10  ;;  %p529_p5 = scmp.lt.s32.totalorder %s523_s10, %s523_s10 }
   0xd   :  { %p530_p6 = por %p529_p5, %p528_p4 }
   0xf   :  { %p531_p7 = pnand %p530_p6, %p524_p3 }
  0x11   :  { %534 = shalt.err (!%p531_p7)
}
  0x12   :  { %s632_s11 = smov 64   ;;  %s633_s12 = smov 4  }
  0x13   :  { %37 = dma.hbm_to_vmem [thread:$0]  %s783_s1, 256, %s32_s25, [#allocation6], %s632_s11, %s632_s11, %s633_s12  }
  0x14   :  { %s634_s15 = smov [#allocation2]   ;;  %s635_s17 = smov [#allocation7]  }
  0x15   :  { %s22_s16 = sshll.u32 %s634_s15, 4  ;;  %s45_s18 = sshll.u32 %s635_s17, 4  ;;  %s23_s16 = int_to_ptr.vmem [resolvable:$true] %s22_s16  ;;  %s46_s18 = int_to_ptr.vmem [resolvable:$true] %s45_s18 }
  0x16   :  { %s535_s21 = scalar_lea.hbm %s782_s0, 128 }
  0x17   :  { %p536_p8 = scmp.ne.s32.totalorder %s782_s0, %s535_s21  ;;  %p539_p9 = scmp.lt.u32.totalorder %s535_s21, %s782_s0 }
  0x19   :  { %p541_p10 = pnand %p539_p9, %p536_p8 }
  0x1b   :  { %544 = shalt.err (!%p541_p10)
}
  0x1c   :  { %s545_s1 = scalar_lea.vmem %s23_s16, 128  ;;  %p550_p12 = scmp.lt.s32.totalorder %s23_s16, %s23_s16 }
  0x1d   :  { %p546_p11 = scmp.ne.s32.totalorder %s23_s16, %s545_s1  ;;  %p551_p13 = scmp.lt.s32.totalorder %s545_s1, %s545_s1 }
  0x1f   :  { %p552_p0 = por %p551_p13, %p550_p12 }
  0x21   :  { %p553_p1 = pnand %p552_p0, %p546_p11 }
  0x23   :  { %556 = shalt.err (!%p553_p1)
}
  0x24   :  { %25 = dma.hbm_to_vmem [thread:$0]  %s782_s0, 128, %s23_s16, [#allocation3]  }
  0x25   :  { %s557_s30 = scalar_lea.hbm %s785_s3, 1024 }
  0x26   :  { %p558_p2 = scmp.ne.s32.totalorder %s785_s3, %s557_s30  ;;  %p561_p3 = scmp.lt.u32.totalorder %s557_s30, %s785_s3 }
  0x28   :  { %p563_p4 = pnand %p561_p3, %p558_p2 }
  0x2a   :  { %566 = shalt.err (!%p563_p4)
}
  0x2b   :  { %s567_s14 = scalar_lea.vmem %s46_s18, 1024  ;;  %p572_p6 = scmp.lt.s32.totalorder %s46_s18, %s46_s18 }
  0x2c   :  { %p568_p5 = scmp.ne.s32.totalorder %s46_s18, %s567_s14  ;;  %p573_p7 = scmp.lt.s32.totalorder %s567_s14, %s567_s14 }
  0x2e   :  { %p574_p8 = por %p573_p7, %p572_p6 }
  0x30   :  { %p575_p9 = pnand %p574_p8, %p568_p5 }
  0x32   :  { %578 = shalt.err (!%p575_p9)
}
  0x33   :  { %51 = dma.hbm_to_vmem [thread:$0]  %s785_s3, 1024, %s46_s18, [#allocation6], %s632_s11, %s632_s11, %s633_s12  }
  0x34   :  { %s636_s16 = smov [#allocation8]   ;;  %s579_s21 = scalar_lea.hbm %s787_s5, 1024 }
  0x35   :  { %s59_s17 = sshll.u32 %s636_s16, 4  ;;  %p580_p10 = scmp.ne.s32.totalorder %s787_s5, %s579_s21  ;;  %s60_s17 = int_to_ptr.vmem [resolvable:$true] %s59_s17 }
  0x36   :  { %p583_p11 = scmp.lt.u32.totalorder %s579_s21, %s787_s5 }
  0x38   :  { %p585_p12 = pnand %p583_p11, %p580_p10 }
  0x3a   :  { %588 = shalt.err (!%p585_p12)
}
  0x3b   :  { %s589_s1 = scalar_lea.vmem %s60_s17, 1024  ;;  %p594_p0 = scmp.lt.s32.totalorder %s60_s17, %s60_s17 }
  0x3c   :  { %p590_p13 = scmp.ne.s32.totalorder %s60_s17, %s589_s1  ;;  %p595_p1 = scmp.lt.s32.totalorder %s589_s1, %s589_s1 }
  0x3e   :  { %p596_p2 = por %p595_p1, %p594_p0 }
  0x40   :  { %p597_p3 = pnand %p596_p2, %p590_p13 }
  0x42   :  { %600 = shalt.err (!%p597_p3)
}
  0x43   :  { %65 = dma.hbm_to_vmem [thread:$0]  %s787_s5, 1024, %s60_s17, [#allocation9], %s632_s11, %s632_s11, %s633_s12  }
  0x44   :  { %623 = dma.done.wait [#allocation3], 128  }
  0x45   :  { %624 = vsyncadd [#allocation3], 4294967168 }
  0x46   :  { %625 = dma.done.wait [#allocation6], 1280  }
  0x47   :  { %626 = vsyncadd [#allocation6], 4294966016 }
  0x48   :  { %627 = dma.done.wait [#allocation9], 1024  }
  0x49   :  { %628 = vsyncadd [#allocation9], 4294966272  ;;  %v637_v0 = vmov 0.0   ;;  %vm638_vm0 = vmmov 0   ;;  %v495_v1 = vld [vmem:[#allocation5] sm:$0xff]   ;;  %v496_v2 = vld [vmem:[#allocation5 + $0x8] sm:$0xff]  }
  0x4a   :  { %438 = vmatprep.subr.bf16.mxu0 %v637_v0  ;;  %442 = vmatprep.mubr.msk.bf16.mxu0 %vm638_vm0, %v637_v0  ;;  %v81_v3 = vld [vmem:[#allocation2] sm:$0xff]  ;;  %v497_v4 = vld [vmem:[#allocation7] sm:$0xff]   ;;  %vm106_vm1 = vcmask 261120   ;;  %v499_v7 = vld [vmem:[#allocation7 + $0x10] sm:$0xff]   ;;  %s639_s28 = smov [#allocation10]  }
  0x4b   :  { %446 = vmatprep.subr.bf16.mxu1 %v637_v0  ;;  %462 = vmatprep.mubr.msk.bf16.mxu1 %vm638_vm0, %v637_v0  ;;  %v82_v5 = vpack.c.bf16 %v81_v3, %v81_v3  ;;  %v498_v6 = vld [vmem:[#allocation7 + $0x8] sm:$0xff]   ;;  %v500_v8 = vld [vmem:[#allocation7 + $0x18] sm:$0xff]   ;;  %v501_v9 = vld [vmem:[#allocation7 + $0x20] sm:$0xff]   ;;  %s384_s29 = sshll.u32 %s639_s28, 4  ;;  %s385_s29 = int_to_ptr.vmem [resolvable:$true] %s384_s29 }
  0x4c   :  { %439 = vmatpush3.bf16.msra.mxu0 %v495_v1  ;;  %447 = vmatpush3.bf16.msra.mxu1 %v497_v4  ;;  %v502_v10 = vld [vmem:[#allocation7 + $0x28] sm:$0xff]   ;;  %v503_v11 = vld [vmem:[#allocation7 + $0x30] sm:$0xff]   ;;  %v504_v12 = vld [vmem:[#allocation7 + $0x38] sm:$0xff]   ;;  %p606_p5 = scmp.lt.s32.totalorder %s385_s29, %s385_s29 }
  0x4d   :  { %440 = vmatprep.subr.bf16.mxu0 %v637_v0  ;;  %448 = vmatprep.subr.bf16.mxu1 %v637_v0  ;;  %v505_v13 = vld [vmem:[#allocation8] sm:$0xff]   ;;  %v506_v14 = vld [vmem:[#allocation8 + $0x8] sm:$0xff]   ;;  %v507_v15 = vld [vmem:[#allocation8 + $0x10] sm:$0xff]  }
  0x4e   :  { %v508_v16 = vld [vmem:[#allocation8 + $0x18] sm:$0xff]   ;;  %v509_v17 = vld [vmem:[#allocation8 + $0x20] sm:$0xff]   ;;  %v510_v18 = vld [vmem:[#allocation8 + $0x28] sm:$0xff]  }
  0x4f   :  { %v395_v19 = vld [vmem:[%s784_s2] ss:$0 sm:$0xff]  ;;  %v511_v27 = vld [vmem:[#allocation8 + $0x30] sm:$0xff]   ;;  %v512_v28 = vld [vmem:[#allocation8 + $0x38] sm:$0xff]  }
  0x50   :  { %441 = vmatpush3.bf16.msra.mxu0 %v496_v2  ;;  %449 = vmatpush3.bf16.msra.mxu1 %v498_v6  ;;  %v399_v29 = vld [vmem:[%s786_s4] ss:$0 sm:$0xff]  ;;  %s601_s4 = scalar_lea.vmem %s385_s29, 64 }
  0x51   :  { %466 = vmatprep.subr.bf16.mxu0 %v637_v0  ;;  %450 = vmatprep.subr.bf16.mxu1 %v637_v0  ;;  %v408_v37 = vld [vmem:[%s788_s6] ss:$0 sm:$0xff]  ;;  %p602_p4 = scmp.ne.s32.totalorder %s385_s29, %s601_s4  ;;  %p607_p6 = scmp.lt.s32.totalorder %s601_s4, %s601_s4 }
  0x53   :  { %443 = vmatmul.mubr.msk.bf16.vlgmr.msra.gmra.mrb[0].mxu0 %vm106_vm1, %v82_v5  ;;  %p608_p7 = por %p607_p6, %p606_p5 }
  0x54   :  { %482 = vmatprep.mubr.msk.bf16.mxu0 %vm638_vm0, %v637_v0  ;;  %451 = vmatpush3.bf16.msra.mxu1 %v499_v7 }
  0x55   :  { %452 = vmatprep.subr.bf16.mxu1 %v637_v0  ;;  %467 = vmatpush3.bf16.msra.mxu0 %v505_v13  ;;  %p609_p8 = pnand %p608_p7, %p602_p4 }
  0x56   :  { %468 = vmatprep.subr.bf16.mxu0 %v637_v0 }
  0x58   :  { %453 = vmatpush3.bf16.msra.mxu1 %v500_v8 }
  0x59   :  { %454 = vmatprep.subr.bf16.mxu1 %v637_v0  ;;  %469 = vmatpush3.bf16.msra.mxu0 %v506_v14 }
  0x5a   :  { %470 = vmatprep.subr.bf16.mxu0 %v637_v0 }
  0x5c   :  { %455 = vmatpush3.bf16.msra.mxu1 %v501_v9 }
  0x5d   :  { %456 = vmatprep.subr.bf16.mxu1 %v637_v0  ;;  %471 = vmatpush3.bf16.msra.mxu0 %v507_v15 }
  0x5e   :  { %472 = vmatprep.subr.bf16.mxu0 %v637_v0 }
  0x60   :  { %457 = vmatpush3.bf16.msra.mxu1 %v502_v10 }
  0x61   :  { %458 = vmatprep.subr.bf16.mxu1 %v637_v0  ;;  %473 = vmatpush3.bf16.msra.mxu0 %v508_v16 }
  0x62   :  { %474 = vmatprep.subr.bf16.mxu0 %v637_v0 }
  0x64   :  { %459 = vmatpush3.bf16.msra.mxu1 %v503_v11 }
  0x65   :  { %460 = vmatprep.subr.bf16.mxu1 %v637_v0  ;;  %475 = vmatpush3.bf16.msra.mxu0 %v509_v17 }
  0x66   :  { %476 = vmatprep.subr.bf16.mxu0 %v637_v0 }
  0x68   :  { %461 = vmatpush3.bf16.msra.mxu1 %v504_v12 }
  0x69   :  { %477 = vmatpush3.bf16.msra.mxu0 %v510_v18 }
  0x6a   :  { %478 = vmatprep.subr.bf16.mxu0 %v637_v0 }
  0x6d   :  { %479 = vmatpush3.bf16.msra.mxu0 %v511_v27 }
  0x6e   :  { %480 = vmatprep.subr.bf16.mxu0 %v637_v0 }
  0x71   :  { %481 = vmatpush3.bf16.msra.mxu0 %v512_v28 }
 0x126   :  { %v144_v20 = vpop.f32.mrb[0].mxu0 }
 0x127   :  { %v145_v21 = vadd.f32 %v395_v19, %v144_v20  ;;  %v444_v22 = vpop.f32.mrb[1].mxu0 }
 0x128   :  { %v147_v23 = vpop.f32.mrb[2].mxu0 }
 0x129   :  { %v150_v24 = vmax.f32 %v145_v21, 0.0  ;;  %v445_v25 = vpop.f32.mrb[3].mxu0 }
 0x12b   :  { %v151_v26 = vpack.c.bf16 %v150_v24, %v150_v24 }
 0x12d   :  { %463 = vmatmul.mubr.bf16.vlgmr.msra.gmra.mrb[0].mxu1 %v151_v26 }
 0x200   :  { %v257_v30 = vpop.f32.mrb[0].mxu1 }
 0x201   :  { %v258_v31 = vadd.f32 %v399_v29, %v257_v30  ;;  %v464_v32 = vpop.f32.mrb[1].mxu1 }
 0x202   :  { %v260_v33 = vpop.f32.mrb[2].mxu1 }
 0x203   :  { %v263_v34 = vmax.f32 %v258_v31, 0.0  ;;  %v465_v35 = vpop.f32.mrb[3].mxu1 }
 0x205   :  { %v264_v36 = vpack.c.bf16 %v263_v34, %v263_v34 }
 0x207   :  { %483 = vmatmul.mubr.bf16.vlgmr.msra.gmra.mrb[4].mxu0 %v264_v36 }
 0x2da   :  { %v370_v38 = vpop.f32.mrb[4].mxu0 }
 0x2db   :  { %v371_v39 = vadd.f32 %v408_v37, %v370_v38  ;;  %v484_v40 = vpop.f32.mrb[5].mxu0 }
 0x2dc   :  { %v373_v41 = vpop.f32.mrb[6].mxu0 }
 0x2dd   :  { %v376_v42 = vpack.c.bf16 %v371_v39, %v371_v39  ;;  %v485_v43 = vpop.f32.mrb[7].mxu0 }
 0x2df   :  { %377 = vst [vmem:[#allocation10] sm:$0xf] %v376_v42 }
 0x2e0   :  { %612 = shalt.err (!%p609_p8)
}
 0x2e1   :  { %s613_s6 = scalar_lea.hbm %s789_s7, 64 }
 0x2e2   :  { %p614_p9 = scmp.ne.s32.totalorder %s789_s7, %s613_s6  ;;  %p617_p10 = scmp.lt.u32.totalorder %s613_s6, %s789_s7 }
 0x2e4   :  { %p619_p11 = pnand %p617_p10, %p614_p9 }
 0x2e6   :  { %622 = shalt.err (!%p619_p11)
}
 0x2e7   :  { %387 = dma.vmem_to_hbm [thread:$0]  %s385_s29, 64, %s789_s7, [#allocation4]  }
 0x2e8   :  { %629 = dma.done.wait [#allocation4], 64  }
 0x2e9   :  { %630 = vsyncadd [#allocation4], 4294967232 }
 0x2ea   :  { %391 = vsyncpa [#allocation3], 1 }
 0x2eb   :  { %392 = vsyncpa [#allocation6], 1 }
 0x2ec   :  { %393 = vsyncpa [#allocation9], 1 }
 0x2ed   :  { %394 = vsyncpa [#allocation4], 1 }

</bundles_post_ra>
